<compile_context>
chip_gen: v7x
topology: tpu7x:2x2x1
jax: 0.10.0
libtpu: 0.0.40
codegen_flags: <defaults>
</compile_context>

<pallas_src>
import functools
import math

import jax
import jax.numpy as jnp
import numpy as np
from jax.experimental import pallas as pl
from jax.experimental.pallas import tpu as pltpu


def _cdiv(a, b):
    return -(-a // b)


def _round_up(a, m):
    return _cdiv(a, m) * m


def _label_smoothing_kernel(logp_ref, tgt_ref, loss_ref, lane_sc, basew_sc, *,
                            sv, conf, padding_idx, padding_col, ent_a, ent_b):
    j = pl.program_id(1)          # arbitrary (accumulation) axis

    @pl.when(j == 0)
    def _():
        # The output block is resident across the arbitrary axis -> accumulator.
        loss_ref[...] = jnp.zeros_like(loss_ref)
        # Hoisted per-column constants: lane index and the "filled" smoothing
        # weights (sv everywhere, 0 in the padding column).
        lane = jax.lax.broadcasted_iota(jnp.int32, lane_sc.shape, 1)
        lane_sc[...] = lane
        basew_sc[...] = jnp.where(lane == padding_col,
                                  jnp.float32(0.0), jnp.float32(sv))

    logp = logp_ref[...].astype(jnp.float32)        # [TB, V] log-probs (f32)
    tgt = tgt_ref[...]                              # [TB, 1] int32

    # Smoothed target distribution p (scatter-after-fill semantics): conf at
    # the target column (even if it is the padding column), sv elsewhere,
    # 0 in the padding column.
    w = jnp.where(lane_sc[...] == tgt, jnp.float32(conf), basew_sc[...])

    # cross_i = sum_j p_ij * logp_ij  (single weighted lane reduce, no log/EUP)
    cross = jnp.sum(w * logp, axis=-1, keepdims=True)            # [TB, 1]

    # entropy_i = sum_j p_ij * log p_ij  -> compile-time constants:
    #   normal row:              (V-2)*sv*log(sv) + conf*log(conf)   (= ent_a)
    #   target == padding col:   (V-1)*sv*log(sv) + conf*log(conf)   (= ent_b)
    ent = jnp.where(tgt == padding_col, jnp.float32(ent_b), jnp.float32(ent_a))

    # Rows whose target equals ignore_index contribute nothing.
    kl_row = jnp.where(tgt == padding_idx, jnp.float32(0.0), ent - cross)

    # Finish the reduction in-kernel (sublane reduce, XLU) and accumulate one
    # scalar per step into the resident (1, 1, 1) output block.
    loss_ref[...] += jnp.sum(kl_row, axis=0, keepdims=True)[None]


def label_smoothing_loss(output, target, *, label_smoothing, tgt_vocab_size,
                         ignore_index, batch_tile=None):
    """output: [B, V] float log-probs, target: [B] int. Returns scalar f32 loss
    equal to F.kl_div(output, smoothed_one_hot(target), reduction='sum')."""
    assert 0.0 < label_smoothing <= 1.0
    B, V = output.shape
    assert V == tgt_vocab_size
    dsize = jnp.dtype(output.dtype).itemsize

    sv = label_smoothing / (tgt_vocab_size - 2)
    conf = 1.0 - label_smoothing
    # torch's one_hot[ignore_index] = 0 uses python (possibly negative) indexing.
    padding_col = ignore_index % tgt_vocab_size
    sv_logsv = sv * math.log(sv) if sv > 0.0 else 0.0
    conf_logconf = conf * math.log(conf) if conf > 0.0 else 0.0
    ent_a = (tgt_vocab_size - 2) * sv_logsv + conf_logconf
    ent_b = ent_a + sv_logsv

    # Per-TensorCore VMEM capacity (v5e/v6e: 128 MiB, v7x: 64 MiB).
    try:
        vmem_cap = int(pltpu.get_tpu_info().vmem_capacity_bytes)
    except Exception:
        vmem_cap = 64 * 1024 * 1024   # conservative (v7x per-TC)

    # Sub-32-bit inputs pack rows along sublanes -> align row tiles accordingly
    # (f32: 8, bf16: 16, int8/fp8: 32).
    row_align = max(8, 32 // dsize)

    if batch_tile is not None:
        assert batch_tile % row_align == 0, (
            f"batch_tile must be a multiple of {row_align} for dtype {output.dtype}")
        nb = max(1, _cdiv(B, batch_tile))
        P = 2 if nb >= 2 else 1
    else:
        # Largest row tile the VMEM budget allows (capped at 512 rows):
        # 2x double-buffered native-dtype input + ~3 live 32-bit [TB,V]
        # temporaries + 2x lane-padded (TB,1) target buffers, per row.
        work_bytes_per_row = V * (2 * dsize + 12) + 2 * 128 * 4
        budget = int(0.70 * vmem_cap) - 2 * 8 * V * 4 - (2 << 20)
        cap_rows = max(row_align, budget // work_bytes_per_row)
        cap_rows = max(row_align, (min(512, cap_rows) // row_align) * row_align)
        # Tile count implied by that capacity tile; make it even so both v7x
        # TensorCores get work, then spread the batch evenly over the tiles
        # (minimizes padded rows while keeping the tile near the VMEM optimum).
        nb = max(1, _cdiv(B, cap_rows))
        P = 2 if nb >= 2 else 1
        nb = P * _cdiv(nb, P)
        batch_tile = min(cap_rows, _round_up(_cdiv(B, nb), row_align))

    nb_inner = _cdiv(nb, P)
    nb = P * nb_inner
    B_pad = nb * batch_tile

    # Padded rows use target == ignore_index and therefore contribute exactly 0.
    tgt1d = target.astype(jnp.int32)
    if B_pad != B:
        output = jnp.pad(output, ((0, B_pad - B), (0, 0)))
        tgt1d = jnp.pad(tgt1d, (0, B_pad - B), constant_values=ignore_index)
    tgt2d = tgt1d.reshape(B_pad, 1)

    vmem_need = (2 * batch_tile * V * dsize        # double-buffered input tile
                 + 3 * batch_tile * V * 4          # live f32/int32 [TB,V] temporaries
                 + 2 * batch_tile * 128 * 4        # lane-padded (TB,1) target buffers
                 + 2 * 8 * V * 4                   # (1,V) lane-iota / base-weight scratch
                 + (2 << 20))                      # pipeline state / slack
    vmem_limit = int(min(int(0.85 * vmem_cap), max(vmem_need, 32 << 20)))

    kernel = functools.partial(
        _label_smoothing_kernel,
        sv=float(sv), conf=float(conf),
        padding_idx=int(ignore_index), padding_col=int(padding_col),
        ent_a=float(ent_a), ent_b=float(ent_b),
    )

    idx = lambda c, j: (c * nb_inner + j, 0)
    lp_spec = pl.BlockSpec((batch_tile, V), idx)
    if batch_tile < 128 and nb_inner >= 3:
        # Huge vocab forced a small tile: deepen input buffering to keep the
        # HBM stream saturated (mainly a v7x / 64 MiB concern).
        try:
            lp_spec = pl.BlockSpec((batch_tile, V), idx,
                                   pipeline_mode=pl.Buffered(3))
        except Exception:
            pass

    cost = pl.CostEstimate(
        flops=int(5 * B_pad * V),
        transcendentals=0,
        bytes_accessed=int(B_pad * V * dsize + B_pad * 4 + P * 4),
    )

    partials = pl.pallas_call(
        kernel,
        out_shape=jax.ShapeDtypeStruct((P, 1, 1), jnp.float32),
        grid_spec=pltpu.PrefetchScalarGridSpec(
            num_scalar_prefetch=0,
            grid=(P, nb_inner),
            in_specs=[
                lp_spec,                                   # log-probs, native dtype
                pl.BlockSpec((batch_tile, 1), idx),        # per-tile targets
            ],
            out_specs=pl.BlockSpec((1, 1, 1), lambda c, j: (c, 0, 0)),
            scratch_shapes=[
                pltpu.VMEM((1, V), jnp.int32),             # lane iota
                pltpu.VMEM((1, V), jnp.float32),           # filled smoothing weights
            ],
        ),
        compiler_params=pltpu.CompilerParams(
            dimension_semantics=("parallel", "arbitrary"),
            vmem_limit_bytes=vmem_limit),
        cost_estimate=cost,
    )(output, tgt2d)

    return jnp.sum(partials)


def _reference(output, target, label_smoothing, vocab, ignore_index):
    """Pure-numpy reproduction of the PyTorch forward."""
    sv = label_smoothing / (vocab - 2)
    conf = 1.0 - label_smoothing
    one_hot = np.full((vocab,), sv, dtype=np.float64)
    one_hot[ignore_index] = 0.0
    mp = np.tile(one_hot[None, :], (target.shape[0], 1))
    mp[np.arange(target.shape[0]), target] = conf
    mp[target == ignore_index] = 0.0
    out64 = np.asarray(output).astype(np.float64)
    safe = np.where(mp > 0, mp, 1.0)
    term = np.where(mp > 0, mp * (np.log(safe) - out64), 0.0)
    return term.sum()


if __name__ == "__main__":
    B, V = 32, 256
    label_smoothing = 0.1
    key = jax.random.PRNGKey(0)
    k1, k2, k3, k4, k5, k6 = jax.random.split(key, 6)

    # Test 1: ignore_index = 0 (a real padding class), auto-sized tile (single tile).
    logits = jax.random.normal(k1, (B, V), dtype=jnp.float32)
    log_probs = jax.nn.log_softmax(logits, axis=-1)     # F.kl_div expects log-probs
    target = jax.random.randint(k2, (B,), 0, V, dtype=jnp.int32)
    target = target.at[1].set(0)                        # include a padded position
    loss = label_smoothing_loss(log_probs, target, label_smoothing=label_smoothing,
                                tgt_vocab_size=V, ignore_index=0)
    loss = jax.block_until_ready(loss)
    ref = _reference(np.asarray(log_probs), np.asarray(target), label_smoothing, V, 0)
    np.testing.assert_allclose(float(loss), float(ref), rtol=2e-5, atol=1e-4)

    # Test 2: negative ignore_index (-100), forced 8-row tiles so the multi-tile
    # accumulation + 2-way parallel grid axis + per-tile target blocks are
    # exercised; one target hits the zeroed column (-100 % V) to check
    # scatter-after-fill semantics.
    logits2 = jax.random.normal(k3, (B, V), dtype=jnp.float32)
    log_probs2 = jax.nn.log_softmax(logits2, axis=-1)
    target2 = jax.random.randint(k4, (B,), 0, V, dtype=jnp.int32)
    target2 = target2.at[2].set(V - 100)
    loss2 = label_smoothing_loss(log_probs2, target2, label_smoothing=label_smoothing,
                                 tgt_vocab_size=V, ignore_index=-100, batch_tile=8)
    loss2 = jax.block_until_ready(loss2)
    ref2 = _reference(np.asarray(log_probs2), np.asarray(target2),
                      label_smoothing, V, -100)
    np.testing.assert_allclose(float(loss2), float(ref2), rtol=2e-5, atol=1e-4)

    # Test 3: awkward batch (B=30 -> padded rows) with bf16 log-probs
    # (16-row-aligned tiles, native-dtype streaming + in-kernel f32 upcast).
    B3 = 30
    logits3 = jax.random.normal(k5, (B3, V), dtype=jnp.float32)
    log_probs3 = jax.nn.log_softmax(logits3, axis=-1).astype(jnp.bfloat16)
    target3 = jax.random.randint(k6, (B3,), 0, V, dtype=jnp.int32)
    target3 = target3.at[0].set(1)                      # a padded position (ignore_index=1)
    loss3 = label_smoothing_loss(log_probs3, target3, label_smoothing=label_smoothing,
                                 tgt_vocab_size=V, ignore_index=1)
    loss3 = jax.block_until_ready(loss3)
    ref3 = _reference(np.asarray(log_probs3), np.asarray(target3),
                      label_smoothing, V, 1)
    np.testing.assert_allclose(float(loss3), float(ref3), rtol=1e-4, atol=1e-3)

    print("KERNEL_OK")
</pallas_src>

<mosaic_0001>
module attributes {stable_mosaic.version = 11 : i64} {
  func.func @_label_smoothing_kernel(%arg0: i32, %arg1: i32, %arg2: memref<32x256xf32, #tpu.memory_space<vmem>>, %arg3: memref<32x1xi32, #tpu.memory_space<vmem>>, %arg4: memref<1x1x1xf32, #tpu.memory_space<vmem>>, %arg5: memref<1x256xi32, #tpu.memory_space<vmem>>, %arg6: memref<1x256xf32, #tpu.memory_space<vmem>>) attributes {dimension_semantics = [#tpu.dimension_semantics<parallel>, #tpu.dimension_semantics<arbitrary>], iteration_bounds = array<i64: 1, 1>, scalar_prefetch = 0 : i64, scratch_operands = 2 : i64, tpu.core_type = #tpu.core_type<tc>, window_params = [{transform_indices = @transform_0, window_bounds = array<i64: 32, 256>}, {transform_indices = @transform_1, window_bounds = array<i64: 32, 1>}, {transform_indices = @transform_2, window_bounds = array<i64: 1, 1, 1>}]} {
    %c0_i32 = arith.constant 0 : i32
    %0 = arith.cmpi eq, %arg1, %c0_i32 : i32
    %1 = arith.extui %0 : i1 to i32
    %c0_i32_0 = arith.constant 0 : i32
    %2 = arith.cmpi ne, %1, %c0_i32_0 : i32
    scf.if %2 {
      %cst_21 = arith.constant 0.000000e+00 : f32
      %33 = vector.broadcast %cst_21 : f32 to vector<1x1x1xf32>
      %c0_22 = arith.constant 0 : index
      %c0_23 = arith.constant 0 : index
      %c0_24 = arith.constant 0 : index
      %34 = vector.load %arg4[%c0_22, %c0_23, %c0_24] : memref<1x1x1xf32, #tpu.memory_space<vmem>>, vector<1x1x1xf32>
      tpu.vector_store %arg4[%c0_22, %c0_23, %c0_24], %33 {strides = array<i32>} : memref<1x1x1xf32, #tpu.memory_space<vmem>>, vector<1x1x1xf32>,
      %35 = tpu.iota {dimensions = array<i32: 1>} : vector<1x256xi32>
      %c0_25 = arith.constant 0 : index
      %c0_26 = arith.constant 0 : index
      %36 = vector.load %arg5[%c0_25, %c0_26] : memref<1x256xi32, #tpu.memory_space<vmem>>, vector<1x256xi32>
      tpu.vector_store %arg5[%c0_25, %c0_26], %35 {strides = array<i32>} : memref<1x256xi32, #tpu.memory_space<vmem>>, vector<1x256xi32>,
      %c0_i32_27 = arith.constant 0 : i32
      %37 = vector.broadcast %c0_i32_27 : i32 to vector<1x256xi32>
      %38 = arith.cmpi eq, %35, %37 : vector<1x256xi32>
      %cst_28 = arith.constant 0.000000e+00 : f32
      %cst_29 = arith.constant 3.93700786E-4 : f32
      %39 = vector.broadcast %cst_28 : f32 to vector<1x256xf32>
      %40 = vector.broadcast %cst_29 : f32 to vector<1x256xf32>
      %41 = arith.select %38, %39, %40 : vector<1x256xi1>, vector<1x256xf32>
      %c0_30 = arith.constant 0 : index
      %c0_31 = arith.constant 0 : index
      %42 = vector.load %arg6[%c0_30, %c0_31] : memref<1x256xf32, #tpu.memory_space<vmem>>, vector<1x256xf32>
      tpu.vector_store %arg6[%c0_30, %c0_31], %41 {strides = array<i32>} : memref<1x256xf32, #tpu.memory_space<vmem>>, vector<1x256xf32>,
    } else {
    }
    %c0 = arith.constant 0 : index
    %c0_1 = arith.constant 0 : index
    %3 = vector.load %arg2[%c0, %c0_1] : memref<32x256xf32, #tpu.memory_space<vmem>>, vector<32x256xf32>
    %c0_2 = arith.constant 0 : index
    %c0_3 = arith.constant 0 : index
    %4 = vector.load %arg3[%c0_2, %c0_3] : memref<32x1xi32, #tpu.memory_space<vmem>>, vector<32x1xi32>
    %c0_4 = arith.constant 0 : index
    %c0_5 = arith.constant 0 : index
    %5 = vector.load %arg5[%c0_4, %c0_5] : memref<1x256xi32, #tpu.memory_space<vmem>>, vector<1x256xi32>
    %6 = vector.broadcast %5 : vector<1x256xi32> to vector<32x256xi32>
    %7 = vector.broadcast %4 : vector<32x1xi32> to vector<32x256xi32>
    %8 = arith.cmpi eq, %6, %7 : vector<32x256xi32>
    %c0_6 = arith.constant 0 : index
    %c0_7 = arith.constant 0 : index
    %9 = vector.load %arg6[%c0_6, %c0_7] : memref<1x256xf32, #tpu.memory_space<vmem>>, vector<1x256xf32>
    %cst = arith.constant 0.899999976 : f32
    %10 = vector.broadcast %cst : f32 to vector<32x256xf32>
    %11 = vector.shape_cast %9 : vector<1x256xf32> to vector<1x256xf32>
    %12 = vector.broadcast %11 : vector<1x256xf32> to vector<32x256xf32>
    %13 = arith.select %8, %10, %12 : vector<32x256xi1>, vector<32x256xf32>
    %14 = arith.mulf %13, %3 : vector<32x256xf32>
    %cst_8 = arith.constant dense<0.000000e+00> : vector<32xf32>
    %15 = vector.multi_reduction <add>, %14, %cst_8 [1] : vector<32x256xf32> to vector<32xf32>
    %16 = vector.shape_cast %15 : vector<32xf32> to vector<32x1xf32>
    %c0_i32_9 = arith.constant 0 : i32
    %17 = vector.broadcast %c0_i32_9 : i32 to vector<32x1xi32>
    %18 = arith.cmpi eq, %4, %17 : vector<32x1xi32>
    %cst_10 = arith.constant -0.881902992 : f32
    %cst_11 = arith.constant -0.878816425 : f32
    %19 = vector.broadcast %cst_10 : f32 to vector<32x1xf32>
    %20 = vector.broadcast %cst_11 : f32 to vector<32x1xf32>
    %21 = arith.select %18, %19, %20 : vector<32x1xi1>, vector<32x1xf32>
    %c0_i32_12 = arith.constant 0 : i32
    %22 = vector.broadcast %c0_i32_12 : i32 to vector<32x1xi32>
    %23 = arith.cmpi eq, %4, %22 : vector<32x1xi32>
    %24 = arith.subf %21, %16 : vector<32x1xf32>
    %cst_13 = arith.constant 0.000000e+00 : f32
    %25 = vector.broadcast %cst_13 : f32 to vector<32x1xf32>
    %26 = arith.select %23, %25, %24 : vector<32x1xi1>, vector<32x1xf32>
    %c0_14 = arith.constant 0 : index
    %c0_15 = arith.constant 0 : index
    %c0_16 = arith.constant 0 : index
    %27 = vector.load %arg4[%c0_14, %c0_15, %c0_16] : memref<1x1x1xf32, #tpu.memory_space<vmem>>, vector<1x1x1xf32>
    %cst_17 = arith.constant dense<0.000000e+00> : vector<1xf32>
    %28 = vector.multi_reduction <add>, %26, %cst_17 [0] : vector<32x1xf32> to vector<1xf32>
    %29 = vector.shape_cast %28 : vector<1xf32> to vector<1x1xf32>
    %30 = vector.shape_cast %29 : vector<1x1xf32> to vector<1x1x1xf32>
    %31 = arith.addf %27, %30 : vector<1x1x1xf32>
    %c0_18 = arith.constant 0 : index
    %c0_19 = arith.constant 0 : index
    %c0_20 = arith.constant 0 : index
    %32 = vector.load %arg4[%c0_18, %c0_19, %c0_20] : memref<1x1x1xf32, #tpu.memory_space<vmem>>, vector<1x1x1xf32>
    tpu.vector_store %arg4[%c0_18, %c0_19, %c0_20], %31 {strides = array<i32>} : memref<1x1x1xf32, #tpu.memory_space<vmem>>, vector<1x1x1xf32>,
    return
  }
  func.func @transform_0(%arg0: i32, %arg1: i32) -> (i32, i32) {
    %c1_i32 = arith.constant 1 : i32
    %0 = arith.muli %arg0, %c1_i32 : i32
    %1 = arith.addi %0, %arg1 : i32
    %c0_i32 = arith.constant 0 : i32
    %c0_i32_0 = arith.constant 0 : i32
    return %1, %c0_i32 : i32, i32
  }
  func.func @transform_1(%arg0: i32, %arg1: i32) -> (i32, i32) {
    %c1_i32 = arith.constant 1 : i32
    %0 = arith.muli %arg0, %c1_i32 : i32
    %1 = arith.addi %0, %arg1 : i32
    %c0_i32 = arith.constant 0 : i32
    %c0_i32_0 = arith.constant 0 : i32
    return %1, %c0_i32 : i32, i32
  }
  func.func @transform_2(%arg0: i32, %arg1: i32) -> (i32, i32, i32) {
    %c0_i32 = arith.constant 0 : i32
    %c0_i32_0 = arith.constant 0 : i32
    %c0_i32_1 = arith.constant 0 : i32
    return %arg0, %c0_i32, %c0_i32_0 : i32, i32, i32
  }
}

</mosaic_0001>

<bundles_post_ra>
// kernel: tpu_custom_call.1
= control target key start
LH: loop header
LB: loop body
LE: loop exit
PB: predicated region body
PF: predicated region fallthrough
CT: control target
= control target key end

     0   :  { %7 = vsyncpa [#allocation5], 0  ;;  %s384_s0 = inlined_call_operand.hbm [shape: f32[32,256], index: 0, kind: input, shape index: {}]   ;;  %s385_s1 = inlined_call_operand.vmem [shape: s32[32,1], index: 1, kind: input, shape index: {}]   ;;  %s386_s2 = inlined_call_operand.hbm [shape: f32[1,1,1], index: 2, kind: output, shape index: {}]  }
   0x1   :  { %8 = vsyncpa [#allocation6], 0  ;;  %s302_s9 = smov [#allocation4]   ;;  %s254_s13 = scalar_lea.hbm %s384_s0, 1024 }
   0x2   :  { %s19_s10 = sshll.u32 %s302_s9, 4  ;;  %p255_p0 = scmp.ne.s32.totalorder %s384_s0, %s254_s13  ;;  %s20_s10 = int_to_ptr.vmem [resolvable:$true] %s19_s10 }
   0x3   :  { %p258_p1 = scmp.lt.u32.totalorder %s254_s13, %s384_s0 }
   0x5   :  { %p260_p2 = pnand %p258_p1, %p255_p0 }
   0x7   :  { %263 = shalt.err (!%p260_p2)
}
   0x8   :  { %s264_s18 = scalar_lea.vmem %s20_s10, 1024  ;;  %p269_p4 = scmp.lt.s32.totalorder %s20_s10, %s20_s10 }
   0x9   :  { %p265_p3 = scmp.ne.s32.totalorder %s20_s10, %s264_s18  ;;  %p270_p5 = scmp.lt.s32.totalorder %s264_s18, %s264_s18 }
   0xb   :  { %p271_p6 = por %p270_p5, %p269_p4 }
   0xd   :  { %p272_p7 = pnand %p271_p6, %p265_p3 }
   0xf   :  { %275 = shalt.err (!%p272_p7)
}
  0x10   :  { %s303_s19 = smov 256   ;;  %s304_s20 = smov 16  }
  0x11   :  { %25 = dma.hbm_to_vmem [thread:$0]  %s384_s0, 1024, %s20_s10, [#allocation5], %s303_s19, %s303_s19, %s304_s20  }
  0x12   :  { %298 = dma.done.wait [#allocation5], 1024  }
  0x13   :  { %299 = vsyncadd [#allocation5], 4294966272  ;;  %v61_v0 = vlaneseq  ;;  %v305_v1 = vmov 0   ;;  %v306_v2 = vmov 1966171168   ;;  %v341_v13 = vld [vmem:[%s385_s1 + $0x10] sm:$0xff] }
  0x14   :  { %253 = vset.pattern.permute.xlu1 %v305_v1  ;;  %252 = vset.pattern.permute.xlu0 %v305_v1  ;;  %v66_v3 = vunpack.c.l.s4 %v306_v2  ;;  %v307_v9 = vmov 0.0003937008   ;;  %v346_v14 = vld [vmem:[%s385_s1] sm:$0xff]  ;;  %v353_v17 = vld [vmem:[%s385_s1 + $0x18] sm:$0xff]  ;;  %v358_v18 = vld [vmem:[%s385_s1 + $0x8] sm:$0xff]  ;;  %vm59_vm10 = vcmask 0  }
  0x15   :  { %v62_v4 = vand.u32 127, %v61_v0  ;;  %v69_v5 = vshrl.u32 %v61_v0, 7  ;;  %135 = vperm.xlu1 %253, %v341_v13   ;;  %129 = vperm.xlu0 %252, %v346_v14   ;;  %vm81_vm1 = vcmp.lt.s32.totalorder %v61_v0, 256  ;;  %v107_v31 = vld [vmem:[#allocation4] sm:$0xff]  ;;  %v108_v32 = vld [vmem:[#allocation4 + $0x8] sm:$0xff]  ;;  %v109_v43 = vld [vmem:[#allocation4 + $0x10] sm:$0xff] }
  0x16   :  { %v67_v6 = vunpack.c.0.s8 %v66_v3  ;;  %v111_v33 = vld [vmem:[#allocation4 + $0x20] sm:$0xff]  ;;  %v112_v34 = vld [vmem:[#allocation4 + $0x28] sm:$0xff]  ;;  %v110_v46 = vld [vmem:[#allocation4 + $0x18] sm:$0xff]  ;;  %v308_v61 = vmov 0.0   ;;  %vm188_vm11 = vcmp.eq.s32.totalorder %v346_v14, 0  ;;  %vm190_vm12 = vcmp.eq.s32.totalorder %v341_v13, 0 }
  0x17   :  { %v63_v7 = vadd.s32 128, %v62_v4  ;;  %vm84_vm0 = vcmp.eq.s32.totalorder %v62_v4, 0  ;;  %v122_v21 = vsub.s32 0, %v69_v5  ;;  %v126_v22 = vsub.s32 1, %v69_v5  ;;  %v113_v49 = vld [vmem:[#allocation4 + $0x30] sm:$0xff]  ;;  %v114_v50 = vld [vmem:[#allocation4 + $0x38] sm:$0xff] }
  0x18   :  { %v70_v8 = vsub.s32 %v67_v6, %v69_v5  ;;  %v86_v10 = vsel %vm84_vm0, 0.0, %v307_v9  ;;  %60 = vst.msk [vmem:[#allocation7] sm:$0x1] %vm59_vm10, %v308_v61  ;;  %v309_v62 = vmov -0.8788164   ;;  %vm189_vm13 = vcmp.eq.s32.totalorder %v358_v18, 0 }
  0x19   :  { %v64_v11 = vcombine.low %v62_v4, %v63_v7  ;;  %v90_v12 = vcombine.low %v86_v10, %v307_v9  ;;  %138 = vperm.xlu1 %253, %v353_v17   ;;  %132 = vperm.xlu0 %252, %v358_v18   ;;  %v192_v63 = vsel %vm188_vm11, -0.881903, %v309_v62  ;;  %v193_v2 = vsel %vm189_vm13, -0.881903, %v309_v62  ;;  %s310_s1 = smov [#allocation7]  }
  0x1a   :  { %v194_v3 = vsel %vm190_vm12, -0.881903, %v309_v62  ;;  %vm191_vm14 = vcmp.eq.s32.totalorder %v353_v17, 0  ;;  %vm205_vm15 = vcmask 7168   ;;  %s228_s30 = sshll.u32 %s310_s1, 4  ;;  %s229_s30 = int_to_ptr.vmem [resolvable:$true] %s228_s30 }
  0x1b   :  { %v71_v15 = vrot.slane %v64_v11, %v70_v8  ;;  %v97_v16 = vrot.slane %v90_v12, %v70_v8  ;;  %v195_v9 = vsel %vm191_vm14, -0.881903, %v309_v62  ;;  %s276_s3 = scalar_lea.vmem %s229_s30, 16  ;;  %s280_s4 = scalar_lea.vmem %s229_s30, 32 }
  0x1c   :  { %p277_p8 = scmp.ne.s32.totalorder %s229_s30, %s276_s3  ;;  %p281_p9 = scmp.lt.s32.totalorder %s229_s30, %s229_s30 }
  0x1d   :  { %v78_v19 = vrot.slane %v71_v15, %v70_v8  ;;  %v104_v20 = vrot.slane %v97_v16, %v70_v8  ;;  %p282_p10 = scmp.lt.s32.totalorder %s280_s4, %s276_s3 }
  0x1f   :  { %83 = vst.msk [vmem:[#allocation2] sm:$0x3] %vm81_vm1, %v78_v19  ;;  %106 = vst.msk [vmem:[#allocation3] sm:$0x3] %vm81_vm1, %v104_v20  ;;  %p283_p11 = por %p282_p10, %p281_p9 }
  0x21   :  { %p284_p12 = pnand %p283_p11, %p277_p8 }
  0x26   :  { %v119_v23 = vld [vmem:[#allocation2] sm:$0x3]  ;;  %v148_v24 = vld [vmem:[#allocation3] sm:$0x3] }
  0x27   :  { %v123_v25 = vrot.slane %v119_v23, %v122_v21  ;;  %v127_v26 = vrot.slane %v119_v23, %v126_v22  ;;  %v153_v27 = vrot.slane %v148_v24, %v122_v21  ;;  %v157_v28 = vrot.slane %v148_v24, %v126_v22 }
  0x94   :  { %v136_v29 = vpop.permute.xlu1 %135  ;;  %v130_v30 = vpop.permute.xlu0 %129 }
  0x95   :  { %vm144_vm2 = vcmp.eq.s32.totalorder %v123_v25, %v136_v29  ;;  %vm145_vm3 = vcmp.eq.s32.totalorder %v127_v26, %v136_v29  ;;  %vm140_vm4 = vcmp.eq.s32.totalorder %v123_v25, %v130_v30  ;;  %vm141_vm5 = vcmp.eq.s32.totalorder %v127_v26, %v130_v30 }
  0x96   :  { %v164_v35 = vsel %vm144_vm2, 0.9, %v153_v27  ;;  %v165_v36 = vsel %vm145_vm3, 0.9, %v157_v28  ;;  %v160_v37 = vsel %vm140_vm4, 0.9, %v153_v27 }
  0x97   :  { %v161_v38 = vsel %vm141_vm5, 0.9, %v157_v28  ;;  %v168_v39 = vmul.f32 %v160_v37, %v107_v31  ;;  %v172_v44 = vmul.f32 %v164_v35, %v111_v33  ;;  %v173_v45 = vmul.f32 %v165_v36, %v112_v34 }
  0x98   :  { %v139_v40 = vpop.permute.xlu1 %138  ;;  %v133_v41 = vpop.permute.xlu0 %132  ;;  %v169_v42 = vmul.f32 %v161_v38, %v108_v32 }
  0x99   :  { %vm146_vm6 = vcmp.eq.s32.totalorder %v123_v25, %v139_v40  ;;  %vm147_vm7 = vcmp.eq.s32.totalorder %v127_v26, %v139_v40  ;;  %vm142_vm8 = vcmp.eq.s32.totalorder %v123_v25, %v133_v41  ;;  %vm143_vm9 = vcmp.eq.s32.totalorder %v127_v26, %v133_v41 }
  0x9a   :  { %v162_v47 = vsel %vm142_vm8, 0.9, %v153_v27  ;;  %v176_v48 = vadd.f32 %v169_v42, %v168_v39  ;;  %v166_v51 = vsel %vm146_vm6, 0.9, %v153_v27  ;;  %v167_v52 = vsel %vm147_vm7, 0.9, %v157_v28 }
  0x9b   :  { %v163_v53 = vsel %vm143_vm9, 0.9, %v157_v28  ;;  %v170_v54 = vmul.f32 %v162_v47, %v109_v43  ;;  %v182_v56 = vadd.f32 %v173_v45, %v172_v44  ;;  %v174_v58 = vmul.f32 %v166_v51, %v113_v49  ;;  %v204_v28 = vld [vmem:[#allocation7] sm:$0x1] }
  0x9c   :  { %177 = vadd.xlane.f32.xlu0 %v176_v48  ;;  %v171_v55 = vmul.f32 %v163_v53, %v110_v46  ;;  %v175_v59 = vmul.f32 %v167_v52, %v114_v50 }
  0x9e   :  { %v179_v57 = vadd.f32 %v171_v55, %v170_v54  ;;  %v185_v60 = vadd.f32 %v175_v59, %v174_v58 }
  0xa0   :  { %180 = vadd.xlane.f32.xlu1 %v179_v57  ;;  %183 = vadd.xlane.f32.xlu0 %v182_v56 }
  0xa4   :  { %186 = vadd.xlane.f32.xlu0 %v185_v60 }
 0x129   :  { %v178_v0 = vpop.xlane.xlu0 %177 }
 0x12a   :  { %v196_v1 = vsub.f32 %v192_v63, %v178_v0 }
 0x12c   :  { %v200_v6 = vsel %vm188_vm11, 0.0, %v196_v1 }
 0x12d   :  { %v181_v4 = vpop.xlane.xlu1 %180  ;;  %v184_v5 = vpop.xlane.xlu0 %183  ;;  %v206_v12 = vsel %vm205_vm15, %v200_v6, 0.0 }
 0x12e   :  { %v197_v7 = vsub.f32 %v193_v2, %v181_v4  ;;  %v198_v8 = vsub.f32 %v194_v3, %v184_v5 }
 0x130   :  { %v201_v10 = vsel %vm189_vm13, 0.0, %v197_v7  ;;  %v202_v11 = vsel %vm190_vm12, 0.0, %v198_v8 }
 0x131   :  { %v207_v13 = vsel %vm205_vm15, %v201_v10, 0.0  ;;  %v187_v14 = vpop.xlane.xlu0 %186  ;;  %v209_v18 = vsel %vm205_vm15, %v202_v11, 0.0 }
 0x132   :  { %v208_v15 = vadd.f32 %v207_v13, %v206_v12  ;;  %v199_v16 = vsub.f32 %v195_v9, %v187_v14 }
 0x134   :  { %v210_v19 = vadd.f32 %v209_v18, %v208_v15  ;;  %v203_v20 = vsel %vm191_vm14, 0.0, %v199_v16 }
 0x135   :  { %v211_v21 = vsel %vm205_vm15, %v203_v20, 0.0 }
 0x136   :  { %v212_v22 = vadd.f32 %v211_v21, %v210_v19 }
 0x138   :  { %v213_v23 = vrot.slane %v212_v22, 4 }
 0x13a   :  { %v214_v24 = vadd.f32 %v213_v23, %v212_v22 }
 0x13c   :  { %v215_v25 = vrot.slane %v214_v24, 2 }
 0x13e   :  { %v216_v26 = vadd.f32 %v215_v25, %v214_v24 }
 0x140   :  { %v217_v27 = vrot.slane %v216_v26, 1 }
 0x142   :  { %v218_v29 = vadd.f32 %v217_v27, %v216_v26 }
 0x144   :  { %v219_v30 = vadd.f32 %v218_v29, %v204_v28 }
 0x146   :  { %221 = vst.msk [vmem:[#allocation7] sm:$0x1] %vm59_vm10, %v219_v30 }
 0x147   :  { %287 = shalt.err (!%p284_p12)
}
 0x148   :  { %s288_s7 = scalar_lea.hbm %s386_s2, 16 }
 0x149   :  { %p289_p13 = scmp.ne.s32.totalorder %s386_s2, %s288_s7  ;;  %p292_p0 = scmp.lt.u32.totalorder %s288_s7, %s386_s2 }
 0x14b   :  { %p294_p1 = pnand %p292_p0, %p289_p13 }
 0x14d   :  { %297 = shalt.err (!%p294_p1)
}
 0x14e   :  { %231 = dma.vmem_to_hbm [thread:$0]  %s229_s30, 16, %s386_s2, [#allocation6]  }
 0x14f   :  { %300 = dma.done.wait [#allocation6], 16  }
 0x150   :  { %301 = vsyncadd [#allocation6], 4294967280 }
 0x151   :  { %235 = vsyncpa [#allocation5], 1 }
 0x152   :  { %236 = vsyncpa [#allocation6], 1 }

</bundles_post_ra>
